<compile_context>
chip_gen: v6e
topology: v6e:2x2x1
jax: 0.10.0
libtpu: 0.0.40
codegen_flags: <defaults>
</compile_context>

<pallas_src>
import functools

import jax
import jax.numpy as jnp
from jax import lax
from jax.experimental import pallas as pl
from jax.experimental.pallas import tpu as pltpu

_SUBLANES = 8
_LANES = 128
# Combined (labels + logits) bytes DMA'd per grid step; double-buffered this is
# ~8 MiB of VMEM -> fits every generation's scoped default with headroom.
_TARGET_TILE_BYTES = 4 * 1024 * 1024
_MIN_PALLAS_ELEMENTS = 65536   # below this, a fused jnp reduction is faster


def _bce_sum_kernel(labels_ref, logits_ref, out_ref, *,
                    n_rows, tile_rows, sub_rows, n_chunks, needs_mask):
    t = pl.program_id(0)

    @pl.when(t == 0)
    def _init():
        out_ref[...] = jnp.zeros_like(out_ref)

    def accumulate(masked):
        def body(i, carry):
            r0 = pl.multiple_of(i * sub_rows, sub_rows)
            # Cast on-chip; inputs cross HBM in their native (possibly narrow) dtype.
            x = logits_ref[pl.ds(r0, sub_rows), :].astype(jnp.float32)
            y = labels_ref[pl.ds(r0, sub_rows), :].astype(jnp.float32)
            # Numerically-stable BCE-with-logits (torch's formulation):
            #   max(x, 0) - x*y + log1p(exp(-|x|))
            bce = jnp.maximum(x, 0.0) - x * y + jnp.log1p(jnp.exp(-jnp.abs(x)))
            if masked:
                # Only rows >= n_rows (block padding past the array end) are invalid.
                row = (t * tile_rows + r0
                       + lax.broadcasted_iota(jnp.int32, bce.shape, 0))
                bce = jnp.where(row < n_rows, bce, 0.0)
            # Accumulate straight into the resident output block (VPU only).
            out_ref[...] += bce
            return carry

        lax.fori_loop(0, n_chunks, body, 0, unroll=(n_chunks <= 8))

    if needs_mask:
        last = pl.num_programs(0) - 1

        @pl.when(t != last)
        def _full_tiles():          # hot path: no mask work at all
            accumulate(False)

        @pl.when(t == last)
        def _last_tile():           # only the last tile contains padded rows
            accumulate(True)
    else:
        accumulate(False)


def primary_loss(class_labels, logits, example_weights, *,
                 min_pallas_elements=_MIN_PALLAS_ELEMENTS):
    """mean(example_weights) * BCEWithLogitsLoss(mean)(logits, class_labels)."""
    assert class_labels.shape == logits.shape
    n = int(logits.size)
    w_mean = jnp.mean(example_weights.astype(jnp.float32))

    if n < min_pallas_elements:
        # pallas_call launch cost dominates at tiny sizes; fused jnp is faster.
        x = logits.astype(jnp.float32)
        y = class_labels.astype(jnp.float32)
        bce = jnp.maximum(x, 0.0) - x * y + jnp.log1p(jnp.exp(-jnp.abs(x)))
        return w_mean * (jnp.sum(bce) / n)

    # Collapse leading dims (free, no data movement); keep the class dim as lanes.
    if logits.ndim == 1:
        logits2 = logits.reshape(1, -1)
        labels2 = class_labels.reshape(1, -1)
    else:
        logits2 = logits.reshape(-1, logits.shape[-1])
        labels2 = class_labels.reshape(-1, class_labels.shape[-1])
    n_rows, n_cols = logits2.shape

    # Compute sub-slice: keep the per-chunk f32 working set at ~16 vregs.
    lane_groups = -(-n_cols // _LANES)
    sub_rows = max(_SUBLANES, (_LANES // lane_groups) // _SUBLANES * _SUBLANES)

    # DMA tile: as many rows as fit the combined byte budget (native dtypes),
    # rounded to a multiple of sub_rows and capped at the (padded) row count.
    row_bytes = n_cols * (labels2.dtype.itemsize + logits2.dtype.itemsize)
    tile_rows = max(sub_rows,
                    (_TARGET_TILE_BYTES // max(row_bytes, 1))
                    // sub_rows * sub_rows)
    padded_rows = -(-n_rows // sub_rows) * sub_rows
    tile_rows = min(tile_rows, padded_rows)

    num_tiles = -(-n_rows // tile_rows)
    n_chunks = tile_rows // sub_rows
    needs_mask = num_tiles * tile_rows != n_rows

    kernel = functools.partial(
        _bce_sum_kernel, n_rows=n_rows, tile_rows=tile_rows,
        sub_rows=sub_rows, n_chunks=n_chunks, needs_mask=needs_mask)

    partials = pl.pallas_call(
        kernel,
        out_shape=jax.ShapeDtypeStruct((sub_rows, n_cols), jnp.float32),
        grid_spec=pltpu.PrefetchScalarGridSpec(
            num_scalar_prefetch=0,
            grid=(num_tiles,),
            in_specs=[
                pl.BlockSpec((tile_rows, n_cols), lambda t: (t, 0)),  # class_labels
                pl.BlockSpec((tile_rows, n_cols), lambda t: (t, 0)),  # logits
            ],
            # Constant block index -> resident accumulator across the grid.
            out_specs=pl.BlockSpec((sub_rows, n_cols), lambda t: (0, 0)),
        ),
        compiler_params=pltpu.CompilerParams(
            dimension_semantics=("arbitrary",),
            vmem_limit_bytes=32 * 1024 * 1024),
    )(labels2, logits2)

    bce_mean = jnp.sum(partials) / n        # BCEWithLogitsLoss(reduction='mean')
    return w_mean * bce_mean                # mean(example_weights * scalar_loss)


def _reference(class_labels, logits, example_weights):
    x = logits.astype(jnp.float32)
    y = class_labels.astype(jnp.float32)
    bce = jnp.maximum(x, 0.0) - x * y + jnp.log1p(jnp.exp(-jnp.abs(x)))
    return jnp.mean(example_weights.astype(jnp.float32)) * jnp.mean(bce)


if __name__ == "__main__":
    key = jax.random.PRNGKey(0)
    keys = jax.random.split(key, 9)

    # Case 1: small shape implied by the module (batch=8, classes=32, f32).
    # min_pallas_elements=0 forces the Pallas path so the kernel is exercised
    # even at this tiny size (default dispatch would use the jnp fallback).
    B, C = 8, 32
    labels = jax.random.bernoulli(keys[0], p=0.5, shape=(B, C)).astype(jnp.float32)
    logits = jax.random.normal(keys[1], (B, C), dtype=jnp.float32)
    weights = jax.random.uniform(keys[2], (B,), dtype=jnp.float32)
    out = jax.block_until_ready(primary_loss(labels, logits, weights,
                                             min_pallas_elements=0))
    ref = _reference(labels, logits, weights)
    assert jnp.allclose(out, ref, rtol=1e-5, atol=1e-6), (out, ref)

    # Case 2: non-aligned rows/cols, bf16 HBM traffic with in-kernel f32 cast;
    # exercises the multi-chunk inner loop and the last-tile row mask.
    B2, C2 = 1000, 77
    labels2 = jax.random.bernoulli(keys[3], p=0.5, shape=(B2, C2)).astype(jnp.bfloat16)
    logits2 = jax.random.normal(keys[4], (B2, C2), dtype=jnp.float32).astype(jnp.bfloat16)
    weights2 = jax.random.uniform(keys[5], (B2,), dtype=jnp.float32)
    out2 = jax.block_until_ready(primary_loss(labels2, logits2, weights2))
    ref2 = _reference(labels2, logits2, weights2)
    assert jnp.allclose(out2, ref2, rtol=1e-4, atol=1e-5), (out2, ref2)

    # Case 3: multi-tile grid (several 4 MiB steps), resident accumulator across
    # grid steps, unmasked full tiles + masked last tile, f32.
    B3, C3 = 10000, 128
    labels3 = jax.random.bernoulli(keys[6], p=0.5, shape=(B3, C3)).astype(jnp.float32)
    logits3 = jax.random.normal(keys[7], (B3, C3), dtype=jnp.float32)
    weights3 = jax.random.uniform(keys[8], (B3,), dtype=jnp.float32)
    out3 = jax.block_until_ready(primary_loss(labels3, logits3, weights3))
    ref3 = _reference(labels3, logits3, weights3)
    assert jnp.allclose(out3, ref3, rtol=1e-5, atol=1e-6), (out3, ref3)

    print("KERNEL_OK")
</pallas_src>

<mosaic_0001>
module attributes {stable_mosaic.version = 11 : i64} {
  func.func @_bce_sum_kernel(%arg0: i32, %arg1: memref<128x32xf32, #tpu.memory_space<vmem>>, %arg2: memref<128x32xf32, #tpu.memory_space<vmem>>, %arg3: memref<128x32xf32, #tpu.memory_space<vmem>>) attributes {dimension_semantics = [#tpu.dimension_semantics<arbitrary>], iteration_bounds = array<i64: 1>, scalar_prefetch = 0 : i64, scratch_operands = 0 : i64, tpu.core_type = #tpu.core_type<tc>, window_params = [{transform_indices = @transform_0, window_bounds = array<i64: 128, 32>}, {transform_indices = @transform_1, window_bounds = array<i64: 128, 32>}, {pipeline_mode = #tpu.pipeline_mode<synchronous>, transform_indices = @transform_2, window_bounds = array<i64: 128, 32>}]} {
    %c0_i32 = arith.constant 0 : i32
    %0 = arith.cmpi eq, %arg0, %c0_i32 : i32
    %1 = arith.extui %0 : i1 to i32
    %c0_i32_0 = arith.constant 0 : i32
    %2 = arith.cmpi ne, %1, %c0_i32_0 : i32
    scf.if %2 {
      %cst = arith.constant 0.000000e+00 : f32
      %9 = vector.broadcast %cst : f32 to vector<128x32xf32>
      %c0 = arith.constant 0 : index
      %c0_5 = arith.constant 0 : index
      %10 = vector.load %arg3[%c0, %c0_5] : memref<128x32xf32, #tpu.memory_space<vmem>>, vector<128x32xf32>
      tpu.vector_store %arg3[%c0, %c0_5], %9 {strides = array<i32>} : memref<128x32xf32, #tpu.memory_space<vmem>>, vector<128x32xf32>,
    } else {
    }
    %c0_i32_1 = arith.constant 0 : i32
    %3 = arith.cmpi ne, %arg0, %c0_i32_1 : i32
    %4 = arith.extui %3 : i1 to i32
    %c0_i32_2 = arith.constant 0 : i32
    %5 = arith.cmpi ne, %4, %c0_i32_2 : i32
    scf.if %5 {
      %c0_i32_5 = arith.constant 0 : i32
      %c128_i32 = arith.constant 128 : i32
      %9 = arith.muli %c0_i32_5, %c128_i32 : i32
      %10 = tpu.assume_multiple %9, 128 : i32
      %11 = arith.index_cast %10 : i32 to index
      %c0 = arith.constant 0 : index
      %12 = vector.load %arg2[%11, %c0] : memref<128x32xf32, #tpu.memory_space<vmem>>, vector<128x32xf32>
      %13 = arith.index_cast %10 : i32 to index
      %c0_6 = arith.constant 0 : index
      %14 = vector.load %arg1[%13, %c0_6] : memref<128x32xf32, #tpu.memory_space<vmem>>, vector<128x32xf32>
      %cst = arith.constant 0.000000e+00 : f32
      %15 = vector.broadcast %cst : f32 to vector<128x32xf32>
      %16 = arith.maximumf %12, %15 : vector<128x32xf32>
      %17 = arith.mulf %12, %14 : vector<128x32xf32>
      %18 = arith.subf %16, %17 : vector<128x32xf32>
      %19 = math.absf %12 : vector<128x32xf32>
      %cst_7 = arith.constant 0.000000e+00 : f32
      %20 = vector.broadcast %cst_7 : f32 to vector<128x32xf32>
      %21 = arith.subf %20, %19 : vector<128x32xf32>
      %22 = math.exp %21 : vector<128x32xf32>
      %23 = math.log1p %22 : vector<128x32xf32>
      %24 = arith.addf %18, %23 : vector<128x32xf32>
      %c0_8 = arith.constant 0 : index
      %c0_9 = arith.constant 0 : index
      %25 = vector.load %arg3[%c0_8, %c0_9] : memref<128x32xf32, #tpu.memory_space<vmem>>, vector<128x32xf32>
      %26 = arith.addf %25, %24 : vector<128x32xf32>
      %c0_10 = arith.constant 0 : index
      %c0_11 = arith.constant 0 : index
      %27 = vector.load %arg3[%c0_10, %c0_11] : memref<128x32xf32, #tpu.memory_space<vmem>>, vector<128x32xf32>
      tpu.vector_store %arg3[%c0_10, %c0_11], %26 {strides = array<i32>} : memref<128x32xf32, #tpu.memory_space<vmem>>, vector<128x32xf32>,
      %c1_i32 = arith.constant 1 : i32
    } else {
    }
    %c0_i32_3 = arith.constant 0 : i32
    %6 = arith.cmpi eq, %arg0, %c0_i32_3 : i32
    %7 = arith.extui %6 : i1 to i32
    %c0_i32_4 = arith.constant 0 : i32
    %8 = arith.cmpi ne, %7, %c0_i32_4 : i32
    scf.if %8 {
      %c0_i32_5 = arith.constant 0 : i32
      %c128_i32 = arith.constant 128 : i32
      %9 = arith.muli %c0_i32_5, %c128_i32 : i32
      %10 = tpu.assume_multiple %9, 128 : i32
      %11 = arith.index_cast %10 : i32 to index
      %c0 = arith.constant 0 : index
      %12 = vector.load %arg2[%11, %c0] : memref<128x32xf32, #tpu.memory_space<vmem>>, vector<128x32xf32>
      %13 = arith.index_cast %10 : i32 to index
      %c0_6 = arith.constant 0 : index
      %14 = vector.load %arg1[%13, %c0_6] : memref<128x32xf32, #tpu.memory_space<vmem>>, vector<128x32xf32>
      %cst = arith.constant 0.000000e+00 : f32
      %15 = vector.broadcast %cst : f32 to vector<128x32xf32>
      %16 = arith.maximumf %12, %15 : vector<128x32xf32>
      %17 = arith.mulf %12, %14 : vector<128x32xf32>
      %18 = arith.subf %16, %17 : vector<128x32xf32>
      %19 = math.absf %12 : vector<128x32xf32>
      %cst_7 = arith.constant 0.000000e+00 : f32
      %20 = vector.broadcast %cst_7 : f32 to vector<128x32xf32>
      %21 = arith.subf %20, %19 : vector<128x32xf32>
      %22 = math.exp %21 : vector<128x32xf32>
      %23 = math.log1p %22 : vector<128x32xf32>
      %24 = arith.addf %18, %23 : vector<128x32xf32>
      %c128_i32_8 = arith.constant 128 : i32
      %25 = arith.muli %arg0, %c128_i32_8 : i32
      %26 = arith.addi %25, %10 : i32
      %27 = tpu.iota {dimensions = array<i32: 0>} : vector<128x32xi32>
      %28 = vector.broadcast %26 : i32 to vector<128x32xi32>
      %29 = arith.addi %28, %27 : vector<128x32xi32>
      %c8_i32 = arith.constant 8 : i32
      %30 = vector.broadcast %c8_i32 : i32 to vector<128x32xi32>
      %31 = arith.cmpi slt, %29, %30 : vector<128x32xi32>
      %cst_9 = arith.constant 0.000000e+00 : f32
      %32 = vector.broadcast %cst_9 : f32 to vector<128x32xf32>
      %33 = arith.select %31, %24, %32 : vector<128x32xi1>, vector<128x32xf32>
      %c0_10 = arith.constant 0 : index
      %c0_11 = arith.constant 0 : index
      %34 = vector.load %arg3[%c0_10, %c0_11] : memref<128x32xf32, #tpu.memory_space<vmem>>, vector<128x32xf32>
      %35 = arith.addf %34, %33 : vector<128x32xf32>
      %c0_12 = arith.constant 0 : index
      %c0_13 = arith.constant 0 : index
      %36 = vector.load %arg3[%c0_12, %c0_13] : memref<128x32xf32, #tpu.memory_space<vmem>>, vector<128x32xf32>
      tpu.vector_store %arg3[%c0_12, %c0_13], %35 {strides = array<i32>} : memref<128x32xf32, #tpu.memory_space<vmem>>, vector<128x32xf32>,
      %c1_i32 = arith.constant 1 : i32
    } else {
    }
    return
  }
  func.func @transform_0(%arg0: i32) -> (i32, i32) {
    %c0_i32 = arith.constant 0 : i32
    %c0_i32_0 = arith.constant 0 : i32
    return %arg0, %c0_i32 : i32, i32
  }
  func.func @transform_1(%arg0: i32) -> (i32, i32) {
    %c0_i32 = arith.constant 0 : i32
    %c0_i32_0 = arith.constant 0 : i32
    return %arg0, %c0_i32 : i32, i32
  }
  func.func @transform_2(%arg0: i32) -> (i32, i32) {
    %c0_i32 = arith.constant 0 : i32
    %c0_i32_0 = arith.constant 0 : i32
    %c0_i32_1 = arith.constant 0 : i32
    return %c0_i32, %c0_i32_0 : i32, i32
  }
}

</mosaic_0001>

<bundles_post_ra>
// kernel: tpu_custom_call.1
= control target key start
LH: loop header
LB: loop body
LE: loop exit
PB: predicated region body
PF: predicated region fallthrough
CT: control target
= control target key end

     0   :  { %7 = vsyncpa [#allocation3], 0  ;;  %s1102_s0 = inlined_call_operand.hbm [shape: f32[8,32], index: 0, kind: input, shape index: {}]   ;;  %s1103_s1 = inlined_call_operand.hbm [shape: f32[8,32], index: 1, kind: input, shape index: {}]   ;;  %s1104_s2 = inlined_call_operand.vmem [shape: f32[128,32], index: 2, kind: output, shape index: {}]  }
   0x1   :  { %8 = vsyncpa [#allocation5], 0 }
   0x2   :  { %13 = vsyncadd [#allocation3], 1920  ;;  %s900_s9 = smov [#allocation2]  }
   0x3   :  { %s14_s10 = sshll.u32 %s900_s9, 4  ;;  %s15_s10 = int_to_ptr.vmem [resolvable:$true] %s14_s10 }
   0x4   :  { %s864_s11 = scalar_lea.vmem %s15_s10, 128  ;;  %s868_s12 = scalar_lea.vmem %s15_s10, 2048 }
   0x5   :  { %p865_p0 = scmp.ne.s32.totalorder %s15_s10, %s864_s11  ;;  %p869_p1 = scmp.lt.s32.totalorder %s15_s10, %s15_s10 }
   0x6   :  { %p870_p2 = scmp.lt.s32.totalorder %s868_s12, %s864_s11 }
   0x8   :  { %p871_p3 = por %p870_p2, %p869_p1 }
   0xa   :  { %p872_p4 = pnand %p871_p3, %p865_p0 }
   0xc   :  { %875 = shalt.err (!%p872_p4)
}
   0xd   :  { %s901_s13 = smov 128   ;;  %s902_s14 = smov 8  }
   0xe   :  { %20 = dma.hbm_to_vmem [thread:$0]  %s1102_s0, 128, %s15_s10, [#allocation3], %s901_s13, %s901_s13, %s902_s14  }
   0xf   :  { %25 = vsyncadd [#allocation5], 1920  ;;  %s903_s17 = smov [#allocation4]  }
  0x10   :  { %s26_s18 = sshll.u32 %s903_s17, 4  ;;  %s27_s18 = int_to_ptr.vmem [resolvable:$true] %s26_s18 }
  0x11   :  { %s884_s19 = scalar_lea.vmem %s27_s18, 128  ;;  %s888_s20 = scalar_lea.vmem %s27_s18, 2048 }
  0x12   :  { %p885_p5 = scmp.ne.s32.totalorder %s27_s18, %s884_s19  ;;  %p889_p6 = scmp.lt.s32.totalorder %s27_s18, %s27_s18 }
  0x13   :  { %p890_p7 = scmp.lt.s32.totalorder %s888_s20, %s884_s19 }
  0x15   :  { %p891_p8 = por %p890_p7, %p889_p6 }
  0x17   :  { %p892_p9 = pnand %p891_p8, %p885_p5 }
  0x19   :  { %895 = shalt.err (!%p892_p9)
}
  0x1a   :  { %32 = dma.hbm_to_vmem [thread:$0]  %s1103_s1, 128, %s27_s18, [#allocation5], %s901_s13, %s901_s13, %s902_s14  }
  0x1b   :  { %896 = dma.done.wait [#allocation3], 2048  }
  0x1c   :  { %897 = vsyncadd [#allocation3], 4294965248 }
  0x1d   :  { %898 = dma.done.wait [#allocation5], 2048  }
  0x1e   :  { %899 = vsyncadd [#allocation5], 4294965248  ;;  %vm43_vm0 = vcmask 261120   ;;  %v904_v0 = vmov 0.0   ;;  %v420_v1 = vld [vmem:[#allocation4] sm:$0xff] }
  0x1f   :  { %44 = vst.msk [vmem:[%s1104_s2] sm:$0xff] %vm43_vm0, %v904_v0  ;;  %45 = vst.msk [vmem:[%s1104_s2 + $0x8] sm:$0xff] %vm43_vm0, %v904_v0  ;;  %v500_v2 = vand.u32 2147483647, %v420_v1  ;;  %v436_v23 = vld [vmem:[#allocation2] sm:$0xff]  ;;  %v452_v25 = vmax.f32 %v420_v1, 0.0 }
  0x20   :  { %46 = vst.msk [vmem:[%s1104_s2 + $0x10] sm:$0xff] %vm43_vm0, %v904_v0  ;;  %47 = vst.msk [vmem:[%s1104_s2 + $0x18] sm:$0xff] %vm43_vm0, %v904_v0  ;;  %v468_v26 = vmul.f32 %v436_v23, %v420_v1 }
  0x21   :  { %48 = vst.msk [vmem:[%s1104_s2 + $0x20] sm:$0xff] %vm43_vm0, %v904_v0  ;;  %49 = vst.msk [vmem:[%s1104_s2 + $0x28] sm:$0xff] %vm43_vm0, %v904_v0  ;;  %v516_v8 = vsub.f32 0.0, %v500_v2 }
  0x22   :  { %50 = vst.msk [vmem:[%s1104_s2 + $0x30] sm:$0xff] %vm43_vm0, %v904_v0  ;;  %51 = vst.msk [vmem:[%s1104_s2 + $0x38] sm:$0xff] %vm43_vm0, %v904_v0  ;;  %v484_v30 = vsub.f32 %v452_v25, %v468_v26 }
  0x23   :  { %52 = vst.msk [vmem:[%s1104_s2 + $0x40] sm:$0xff] %vm43_vm0, %v904_v0  ;;  %53 = vst.msk [vmem:[%s1104_s2 + $0x48] sm:$0xff] %vm43_vm0, %v904_v0  ;;  %v532_v15 = vmul.f32 1.442695, %v516_v8 }
  0x24   :  { %54 = vst.msk [vmem:[%s1104_s2 + $0x50] sm:$0xff] %vm43_vm0, %v904_v0  ;;  %55 = vst.msk [vmem:[%s1104_s2 + $0x58] sm:$0xff] %vm43_vm0, %v904_v0 }
  0x25   :  { %56 = vst.msk [vmem:[%s1104_s2 + $0x60] sm:$0xff] %vm43_vm0, %v904_v0  ;;  %57 = vst.msk [vmem:[%s1104_s2 + $0x68] sm:$0xff] %vm43_vm0, %v904_v0  ;;  %852 = vpow2.f32 %v532_v15 }
  0x26   :  { %58 = vst.msk [vmem:[%s1104_s2 + $0x70] sm:$0xff] %vm43_vm0, %v904_v0  ;;  %59 = vst.msk [vmem:[%s1104_s2 + $0x78] sm:$0xff] %vm43_vm0, %v904_v0  ;;  %v793_v3 = vld [vmem:[%s1104_s2 + $0x8] sm:$0xff]  ;;  %v792_v33 = vld [vmem:[%s1104_s2] sm:$0xff] }
  0x27   :  { %v794_v4 = vld [vmem:[%s1104_s2 + $0x10] sm:$0xff]  ;;  %826 = vst.msk [vmem:[%s1104_s2 + $0x8] sm:$0xff] %vm43_vm0, %v793_v3  ;;  %v795_v5 = vld [vmem:[%s1104_s2 + $0x18] sm:$0xff] }
  0x28   :  { %827 = vst.msk [vmem:[%s1104_s2 + $0x10] sm:$0xff] %vm43_vm0, %v794_v4  ;;  %v796_v6 = vld [vmem:[%s1104_s2 + $0x20] sm:$0xff]  ;;  %v797_v7 = vld [vmem:[%s1104_s2 + $0x28] sm:$0xff]  ;;  %828 = vst.msk [vmem:[%s1104_s2 + $0x18] sm:$0xff] %vm43_vm0, %v795_v5 }
  0x29   :  { %829 = vst.msk [vmem:[%s1104_s2 + $0x20] sm:$0xff] %vm43_vm0, %v796_v6  ;;  %830 = vst.msk [vmem:[%s1104_s2 + $0x28] sm:$0xff] %vm43_vm0, %v797_v7  ;;  %v798_v9 = vld [vmem:[%s1104_s2 + $0x30] sm:$0xff]  ;;  %v799_v10 = vld [vmem:[%s1104_s2 + $0x38] sm:$0xff] }
  0x2a   :  { %v800_v11 = vld [vmem:[%s1104_s2 + $0x40] sm:$0xff]  ;;  %831 = vst.msk [vmem:[%s1104_s2 + $0x30] sm:$0xff] %vm43_vm0, %v798_v9  ;;  %832 = vst.msk [vmem:[%s1104_s2 + $0x38] sm:$0xff] %vm43_vm0, %v799_v10  ;;  %v801_v12 = vld [vmem:[%s1104_s2 + $0x48] sm:$0xff] }
  0x2b   :  { %833 = vst.msk [vmem:[%s1104_s2 + $0x40] sm:$0xff] %vm43_vm0, %v800_v11  ;;  %v802_v13 = vld [vmem:[%s1104_s2 + $0x50] sm:$0xff]  ;;  %v803_v14 = vld [vmem:[%s1104_s2 + $0x58] sm:$0xff]  ;;  %834 = vst.msk [vmem:[%s1104_s2 + $0x48] sm:$0xff] %vm43_vm0, %v801_v12 }
  0x2c   :  { %835 = vst.msk [vmem:[%s1104_s2 + $0x50] sm:$0xff] %vm43_vm0, %v802_v13  ;;  %836 = vst.msk [vmem:[%s1104_s2 + $0x58] sm:$0xff] %vm43_vm0, %v803_v14  ;;  %v804_v16 = vld [vmem:[%s1104_s2 + $0x60] sm:$0xff]  ;;  %v805_v17 = vld [vmem:[%s1104_s2 + $0x68] sm:$0xff] }
  0x2d   :  { %v806_v18 = vld [vmem:[%s1104_s2 + $0x70] sm:$0xff]  ;;  %837 = vst.msk [vmem:[%s1104_s2 + $0x60] sm:$0xff] %vm43_vm0, %v804_v16  ;;  %838 = vst.msk [vmem:[%s1104_s2 + $0x68] sm:$0xff] %vm43_vm0, %v805_v17  ;;  %v807_v19 = vld [vmem:[%s1104_s2 + $0x78] sm:$0xff] }
  0x2e   :  { %839 = vst.msk [vmem:[%s1104_s2 + $0x70] sm:$0xff] %vm43_vm0, %v806_v18  ;;  %840 = vst.msk [vmem:[%s1104_s2 + $0x78] sm:$0xff] %vm43_vm0, %v807_v19 }
  0x32   :  { %v853_v20 = vpop.eup %852 }
  0x33   :  { %v564_v21 = vadd.f32 1.0, %v853_v20  ;;  %v567_v22 = vmul.f32 -0.5, %v853_v20  ;;  %v570_v27 = vand.u32 2147483647, %v853_v20 }
  0x35   :  { %854 = vlog2.f32 %v564_v21  ;;  %v568_v24 = vadd.f32 1.0, %v567_v22  ;;  %vm571_vm1 = vcmp.lt.f32.partialorder %v570_v27, 0.0004427343 }
  0x37   :  { %v569_v28 = vmul.f32 %v853_v20, %v568_v24 }
  0x42   :  { %v855_v29 = vpop.eup %854 }
  0x43   :  { %v566_v31 = vmul.f32 0.6931472, %v855_v29 }
  0x45   :  { %v572_v32 = vsel %vm571_vm1, %v569_v28, %v566_v31 }
  0x46   :  { %v708_v34 = vadd.f32 %v572_v32, %v484_v30 }
  0x48   :  { %v808_v35 = vadd.f32 %v792_v33, %v708_v34 }
  0x4a   :  { %825 = vst.msk [vmem:[%s1104_s2] sm:$0xff] %vm43_vm0, %v808_v35 }
  0x4b   :  { %845 = vsyncpa [#allocation3], 1 }
  0x4c   :  { %846 = vsyncpa [#allocation5], 1 }

</bundles_post_ra>
